<compile_context>
chip_gen: v7x
topology: tpu7x:2x2x1
jax: 0.10.0
libtpu: 0.0.40
codegen_flags: <defaults>
</compile_context>

<pallas_src>
import functools

import numpy as np
import jax
import jax.numpy as jnp
from jax.experimental import pallas as pl
from jax.experimental.pallas import tpu as pltpu


def _round_up(x, m):
    return ((x + m - 1) // m) * m


def _cdiv(a, b):
    return (a + b - 1) // b


# ----------------------------- Pallas kernel ------------------------------ #

def _wfm_kernel(cur_ref, nxt_ref, w_ref, o_ref, *, tap_offsets, tile, c_out):
    """One lane tile of the shift-and-matmul wFM contraction.

    cur_ref: (2*C_in, T)           current lane tile of stacked [log(mag+eps); ang]
    nxt_ref: (2*C_in, T)           next lane tile (halo for the shifted taps)
    w_ref  : (K, 2*C_out, 2*C_in)  per-tap block-diagonal fused weights (f32)
    o_ref  : (2*C_out, T)          stacked [mag (pre-exp applied here); ang]
    """
    # (2*C_in, 2T) window; every tap is a static lane-shifted slice of it.
    win = jnp.concatenate([cur_ref[...], nxt_ref[...]], axis=-1)
    acc = jnp.zeros((2 * c_out, tile), jnp.float32)
    for k, d in enumerate(tap_offsets):          # K is small & static: unrolled
        acc = acc + jnp.dot(w_ref[k], win[:, d:d + tile],
                            preferred_element_type=jnp.float32)
    # Magnitude rows get the exp (weighted Frechet mean in log space); angle
    # rows are already the weighted mean.  Single lane-dense store.
    o_ref[...] = jnp.concatenate([jnp.exp(acc[:c_out]), acc[c_out:]], axis=0)


# ------------------------------- JAX glue --------------------------------- #

def wfm_conv2d(x, w1, w2, kernel_size, stride=(1, 1), padding=(0, 0),
               eps=1e-5, tbl=2048):
    """x: (B, 2, C_in, H, W) polar (mag, ang).  Returns (B, 2, C_out, Ho, Wo)."""
    B, mag_ang, C_in, H, W = x.shape
    assert mag_ang == 2, "Input must be complex valued in polar form (mag, ang)"
    assert tbl % 128 == 0, "lane tile must be a multiple of the 128-lane width"
    C_out = w2.shape[0]
    kh, kw = kernel_size
    sh, sw = stride
    ph, pw = padding
    K = kh * kw
    Hp, Wp = H + 2 * ph, W + 2 * pw
    Ho = (Hp - kh) // sh + 1
    Wo = (Wp - kw) // sw + 1
    assert Ho > 0 and Wo > 0

    # -- input prep: zero-pad (nn.Unfold semantics), hoist the log, flatten --
    magp = jnp.pad(x[:, 0], ((0, 0), (0, 0), (ph, ph), (pw, pw)))
    angp = jnp.pad(x[:, 1], ((0, 0), (0, 0), (ph, ph), (pw, pw)))
    logm = jnp.log(magp + eps)                       # log hoisted out of kernel
    m_flat = B * Hp * Wp                             # flat lane axis: b, h, w
    x_stack = jnp.concatenate(
        [logm.transpose(1, 0, 2, 3).reshape(C_in, m_flat),
         angp.transpose(1, 0, 2, 3).reshape(C_in, m_flat)],
        axis=0).astype(jnp.float32)                  # (2*C_in, B*Hp*Wp)

    # -- fused per-tap weights (tiny, f32); dropout(p=0) is the identity --
    # TODO(synk): weight_dropout > 0 would need per-call masking of w1/w2.
    wmm1 = w1 ** 2 / jnp.sum(w1 ** 2, axis=1, keepdims=True)   # rows sum to 1
    wmm2 = w2 ** 2 / jnp.sum(w2 ** 2, axis=1, keepdims=True)
    wma1 = w1 ** 2 / jnp.sum(w1 ** 2)                          # global sum = 1
    wma2 = w2 ** 2 / jnp.sum(w2 ** 2)
    wm_k = wmm2[None, :, :] * wmm1.T[:, None, :]               # (K, C_out, C_in)
    wa_k = wma2[None, :, :] * wma1.T[:, None, :]
    zero = jnp.zeros_like(wm_k)
    w_taps = jnp.concatenate(                                  # (K, 2Co, 2Ci)
        [jnp.concatenate([wm_k, zero], axis=2),
         jnp.concatenate([zero, wa_k], axis=2)], axis=1).astype(jnp.float32)

    # -- tiling: lane-dense tiles, >=2 grid steps when possible (v7x megacore),
    #    halo fits inside one block, VMEM budgeted --
    d_max = (kh - 1) * Wp + (kw - 1)                 # largest tap lane offset
    bytes_per_lane = (2 * (2 * C_in) + (2 * C_out)) * 4   # cur + nxt + out
    t_budget = max(128, (40 * 2**20 // (4 * bytes_per_lane)) // 128 * 128)
    half = max(128, _round_up(_cdiv(m_flat, 2), 128))
    t_eff = min(tbl, half, _round_up(m_flat, 128), t_budget)
    t_eff = max(t_eff, _round_up(max(d_max, 1), 128))
    n_steps = _cdiv(m_flat, t_eff)
    m_out = n_steps * t_eff
    m_in = (n_steps + 1) * t_eff    # +1 block so the "next" tile always exists
    x_stack = jnp.pad(x_stack, ((0, 0), (0, m_in - m_flat)))

    tap_offsets = tuple(i * Wp + j for i in range(kh) for j in range(kw))
    kernel = functools.partial(_wfm_kernel, tap_offsets=tap_offsets,
                               tile=t_eff, c_out=C_out)
    vmem_limit = int(min(64 * 2**20, max(32 * 2**20, 4 * bytes_per_lane * t_eff)))

    out = pl.pallas_call(
        kernel,
        out_shape=jax.ShapeDtypeStruct((2 * C_out, m_out), jnp.float32),
        grid=(n_steps,),
        in_specs=[
            pl.BlockSpec((2 * C_in, t_eff), lambda i: (0, i)),      # current tile
            pl.BlockSpec((2 * C_in, t_eff), lambda i: (0, i + 1)),  # halo tile
            pl.BlockSpec((K, 2 * C_out, 2 * C_in), lambda i: (0, 0, 0)),
        ],
        out_specs=pl.BlockSpec((2 * C_out, t_eff), lambda i: (0, i)),
        compiler_params=pltpu.CompilerParams(
            dimension_semantics=("parallel",),
            vmem_limit_bytes=vmem_limit),
    )(x_stack, x_stack, w_taps)

    # Dense stride-1 outputs over the padded grid -> keep valid strided
    # positions and split mag/ang.
    # TODO(synk): a strided read path inside the kernel would avoid the sh*sw
    # oversampling for stride > 1 (stride == 1, the demo case, has zero waste).
    out = out[:, :m_flat].reshape(2 * C_out, B, Hp, Wp)
    out = out[:, :, :(Ho - 1) * sh + 1:sh, :(Wo - 1) * sw + 1:sw]
    out = out.reshape(2, C_out, B, Ho, Wo)
    return out.transpose(2, 0, 1, 3, 4)              # (B, 2, C_out, Ho, Wo)


# --------------------------- pure-JAX reference ---------------------------- #

def _unfold_patches(x, kernel_size, stride, padding):
    """torch.nn.Unfold-ordered patches.  x: (N, C, H, W) -> (N, L, C, K)."""
    N, C, H, W = x.shape
    kh, kw = kernel_size
    sh, sw = stride
    ph, pw = padding
    xp = jnp.pad(x, ((0, 0), (0, 0), (ph, ph), (pw, pw)))
    Ho = (H + 2 * ph - kh) // sh + 1
    Wo = (W + 2 * pw - kw) // sw + 1
    taps = []
    for i in range(kh):
        for j in range(kw):
            taps.append(xp[:, :, i:i + sh * (Ho - 1) + 1:sh,
                           j:j + sw * (Wo - 1) + 1:sw])
    p = jnp.stack(taps, axis=2)                      # (N, C, K, Ho, Wo)
    p = p.reshape(N, C, kh * kw, Ho * Wo)            # (N, C, K, L)
    return p.transpose(0, 3, 1, 2)                   # (N, L, C, K)


def wfm_ref(x, w1, w2, kernel_size, stride, padding, eps):
    B, _, C_in, H, W = x.shape
    C_out = w2.shape[0]
    kh, kw = kernel_size
    Ho = (H + 2 * padding[0] - kh) // stride[0] + 1
    Wo = (W + 2 * padding[1] - kw) // stride[1] + 1
    L = Ho * Wo
    patches = _unfold_patches(x.reshape(B * 2, C_in, H, W),
                              kernel_size, stride, padding)
    patches = patches.reshape(B, 2, L, C_in, kh * kw)
    pm = patches[:, 0].reshape(B * L, C_in, kh * kw)
    pa = patches[:, 1].reshape(B * L, C_in, kh * kw)
    wmm1 = w1 ** 2 / jnp.sum(w1 ** 2, axis=1, keepdims=True)
    wmm2 = w2 ** 2 / jnp.sum(w2 ** 2, axis=1, keepdims=True)
    wma1 = w1 ** 2 / jnp.sum(w1 ** 2)
    wma2 = w2 ** 2 / jnp.sum(w2 ** 2)
    om = jnp.exp(jnp.sum(jnp.log(pm + eps) * wmm1, axis=2) @ wmm2.T)
    oa = jnp.sum(pa * wma1, axis=2) @ wma2.T
    om = om.reshape(B, Ho, Wo, C_out).transpose(0, 3, 1, 2)
    oa = oa.reshape(B, Ho, Wo, C_out).transpose(0, 3, 1, 2)
    return jnp.stack([om, oa], axis=1)


# --------------------------------- main ------------------------------------ #

if __name__ == "__main__":
    key = jax.random.PRNGKey(0)
    k1, k2, k3, k4 = jax.random.split(key, 4)

    B, C_in, C_out, H, W = 2, 4, 8, 16, 16
    kernel_size, stride, padding = (3, 3), (1, 1), (0, 0)
    eps = 1e-5

    # Input in polar form (mag, ang): (B, 2, C_in, H, W)
    mag = jax.random.uniform(k1, (B, 1, C_in, H, W), jnp.float32, 0.5, 1.5)
    ang = jax.random.uniform(k2, (B, 1, C_in, H, W), jnp.float32,
                             -float(np.pi), float(np.pi))
    x = jnp.concatenate([mag, ang], axis=1)

    # Parameters (torch.rand equivalents, deterministic).
    w1 = jax.random.uniform(k3, (C_in, kernel_size[0] * kernel_size[1]),
                            jnp.float32)                    # weight_matrix_ang1
    w2 = jax.random.uniform(k4, (C_out, C_in), jnp.float32)  # weight_matrix_ang2

    out = wfm_conv2d(x, w1, w2, kernel_size, stride, padding, eps)
    out = jax.block_until_ready(out)

    ref = wfm_ref(x, w1, w2, kernel_size, stride, padding, eps)
    Ho = (H + 2 * padding[0] - kernel_size[0]) // stride[0] + 1
    Wo = (W + 2 * padding[1] - kernel_size[1]) // stride[1] + 1
    assert out.shape == (B, 2, C_out, Ho, Wo), out.shape
    # All math is f32; tolerance only covers default (bf16-pass) MXU f32
    # matmul precision differences vs the XLA reference.
    np.testing.assert_allclose(np.asarray(out), np.asarray(ref),
                               rtol=1e-2, atol=1e-2)
    print("KERNEL_OK")
</pallas_src>

<mosaic_0001>
module attributes {stable_mosaic.version = 11 : i64} {
  func.func @_wfm_kernel(%arg0: i32, %arg1: memref<8x256xf32, #tpu.memory_space<vmem>>, %arg2: memref<8x256xf32, #tpu.memory_space<vmem>>, %arg3: memref<9x16x8xf32, #tpu.memory_space<vmem>>, %arg4: memref<16x256xf32, #tpu.memory_space<vmem>>) attributes {dimension_semantics = [#tpu.dimension_semantics<parallel>], iteration_bounds = array<i64: 2>, scalar_prefetch = 0 : i64, scratch_operands = 0 : i64, tpu.core_type = #tpu.core_type<tc>, window_params = [{transform_indices = @transform_0, window_bounds = array<i64: 8, 256>}, {transform_indices = @transform_1, window_bounds = array<i64: 8, 256>}, {pipeline_mode = #tpu.pipeline_mode<synchronous>, transform_indices = @transform_2, window_bounds = array<i64: 9, 16, 8>}, {transform_indices = @transform_3, window_bounds = array<i64: 16, 256>}]} {
    %c0 = arith.constant 0 : index
    %c0_0 = arith.constant 0 : index
    %0 = vector.load %arg1[%c0, %c0_0] : memref<8x256xf32, #tpu.memory_space<vmem>>, vector<8x256xf32>
    %c0_1 = arith.constant 0 : index
    %c0_2 = arith.constant 0 : index
    %1 = vector.load %arg2[%c0_1, %c0_2] : memref<8x256xf32, #tpu.memory_space<vmem>>, vector<8x256xf32>
    %2 = tpu.concatenate %0, %1 in 1 : vector<8x256xf32>, vector<8x256xf32> -> vector<8x512xf32>
    %cst = arith.constant 0.000000e+00 : f32
    %3 = vector.broadcast %cst : f32 to vector<16x256xf32>
    %c0_3 = arith.constant 0 : index
    %c0_4 = arith.constant 0 : index
    %c0_5 = arith.constant 0 : index
    %4 = vector.load %arg3[%c0_3, %c0_4, %c0_5] : memref<9x16x8xf32, #tpu.memory_space<vmem>>, vector<1x16x8xf32>
    %5 = vector.shape_cast %4 : vector<1x16x8xf32> to vector<16x8xf32>
    %6 = vector.extract_strided_slice %2 {offsets = [0, 0], sizes = [8, 256], strides = [1, 1]} : vector<8x512xf32> to vector<8x256xf32>
    %cst_6 = arith.constant dense<0.000000e+00> : vector<16x256xf32>
    %7 = tpu.matmul %5, %6, %cst_6 {dimension_numbers = #tpu.dot_dimension_numbers<[1], [0], [0], [1], [0, 0, 1, 1], [], []>} : vector<16x8xf32>, vector<8x256xf32>, vector<16x256xf32> -> vector<16x256xf32>
    %8 = arith.addf %3, %7 : vector<16x256xf32>
    %c1 = arith.constant 1 : index
    %c0_7 = arith.constant 0 : index
    %c0_8 = arith.constant 0 : index
    %9 = vector.load %arg3[%c1, %c0_7, %c0_8] : memref<9x16x8xf32, #tpu.memory_space<vmem>>, vector<1x16x8xf32>
    %10 = vector.shape_cast %9 : vector<1x16x8xf32> to vector<16x8xf32>
    %11 = vector.extract_strided_slice %2 {offsets = [0, 1], sizes = [8, 256], strides = [1, 1]} : vector<8x512xf32> to vector<8x256xf32>
    %cst_9 = arith.constant dense<0.000000e+00> : vector<16x256xf32>
    %12 = tpu.matmul %10, %11, %cst_9 {dimension_numbers = #tpu.dot_dimension_numbers<[1], [0], [0], [1], [0, 0, 1, 1], [], []>} : vector<16x8xf32>, vector<8x256xf32>, vector<16x256xf32> -> vector<16x256xf32>
    %13 = arith.addf %8, %12 : vector<16x256xf32>
    %c2 = arith.constant 2 : index
    %c0_10 = arith.constant 0 : index
    %c0_11 = arith.constant 0 : index
    %14 = vector.load %arg3[%c2, %c0_10, %c0_11] : memref<9x16x8xf32, #tpu.memory_space<vmem>>, vector<1x16x8xf32>
    %15 = vector.shape_cast %14 : vector<1x16x8xf32> to vector<16x8xf32>
    %16 = vector.extract_strided_slice %2 {offsets = [0, 2], sizes = [8, 256], strides = [1, 1]} : vector<8x512xf32> to vector<8x256xf32>
    %cst_12 = arith.constant dense<0.000000e+00> : vector<16x256xf32>
    %17 = tpu.matmul %15, %16, %cst_12 {dimension_numbers = #tpu.dot_dimension_numbers<[1], [0], [0], [1], [0, 0, 1, 1], [], []>} : vector<16x8xf32>, vector<8x256xf32>, vector<16x256xf32> -> vector<16x256xf32>
    %18 = arith.addf %13, %17 : vector<16x256xf32>
    %c3 = arith.constant 3 : index
    %c0_13 = arith.constant 0 : index
    %c0_14 = arith.constant 0 : index
    %19 = vector.load %arg3[%c3, %c0_13, %c0_14] : memref<9x16x8xf32, #tpu.memory_space<vmem>>, vector<1x16x8xf32>
    %20 = vector.shape_cast %19 : vector<1x16x8xf32> to vector<16x8xf32>
    %21 = vector.extract_strided_slice %2 {offsets = [0, 16], sizes = [8, 256], strides = [1, 1]} : vector<8x512xf32> to vector<8x256xf32>
    %cst_15 = arith.constant dense<0.000000e+00> : vector<16x256xf32>
    %22 = tpu.matmul %20, %21, %cst_15 {dimension_numbers = #tpu.dot_dimension_numbers<[1], [0], [0], [1], [0, 0, 1, 1], [], []>} : vector<16x8xf32>, vector<8x256xf32>, vector<16x256xf32> -> vector<16x256xf32>
    %23 = arith.addf %18, %22 : vector<16x256xf32>
    %c4 = arith.constant 4 : index
    %c0_16 = arith.constant 0 : index
    %c0_17 = arith.constant 0 : index
    %24 = vector.load %arg3[%c4, %c0_16, %c0_17] : memref<9x16x8xf32, #tpu.memory_space<vmem>>, vector<1x16x8xf32>
    %25 = vector.shape_cast %24 : vector<1x16x8xf32> to vector<16x8xf32>
    %26 = vector.extract_strided_slice %2 {offsets = [0, 17], sizes = [8, 256], strides = [1, 1]} : vector<8x512xf32> to vector<8x256xf32>
    %cst_18 = arith.constant dense<0.000000e+00> : vector<16x256xf32>
    %27 = tpu.matmul %25, %26, %cst_18 {dimension_numbers = #tpu.dot_dimension_numbers<[1], [0], [0], [1], [0, 0, 1, 1], [], []>} : vector<16x8xf32>, vector<8x256xf32>, vector<16x256xf32> -> vector<16x256xf32>
    %28 = arith.addf %23, %27 : vector<16x256xf32>
    %c5 = arith.constant 5 : index
    %c0_19 = arith.constant 0 : index
    %c0_20 = arith.constant 0 : index
    %29 = vector.load %arg3[%c5, %c0_19, %c0_20] : memref<9x16x8xf32, #tpu.memory_space<vmem>>, vector<1x16x8xf32>
    %30 = vector.shape_cast %29 : vector<1x16x8xf32> to vector<16x8xf32>
    %31 = vector.extract_strided_slice %2 {offsets = [0, 18], sizes = [8, 256], strides = [1, 1]} : vector<8x512xf32> to vector<8x256xf32>
    %cst_21 = arith.constant dense<0.000000e+00> : vector<16x256xf32>
    %32 = tpu.matmul %30, %31, %cst_21 {dimension_numbers = #tpu.dot_dimension_numbers<[1], [0], [0], [1], [0, 0, 1, 1], [], []>} : vector<16x8xf32>, vector<8x256xf32>, vector<16x256xf32> -> vector<16x256xf32>
    %33 = arith.addf %28, %32 : vector<16x256xf32>
    %c6 = arith.constant 6 : index
    %c0_22 = arith.constant 0 : index
    %c0_23 = arith.constant 0 : index
    %34 = vector.load %arg3[%c6, %c0_22, %c0_23] : memref<9x16x8xf32, #tpu.memory_space<vmem>>, vector<1x16x8xf32>
    %35 = vector.shape_cast %34 : vector<1x16x8xf32> to vector<16x8xf32>
    %36 = vector.extract_strided_slice %2 {offsets = [0, 32], sizes = [8, 256], strides = [1, 1]} : vector<8x512xf32> to vector<8x256xf32>
    %cst_24 = arith.constant dense<0.000000e+00> : vector<16x256xf32>
    %37 = tpu.matmul %35, %36, %cst_24 {dimension_numbers = #tpu.dot_dimension_numbers<[1], [0], [0], [1], [0, 0, 1, 1], [], []>} : vector<16x8xf32>, vector<8x256xf32>, vector<16x256xf32> -> vector<16x256xf32>
    %38 = arith.addf %33, %37 : vector<16x256xf32>
    %c7 = arith.constant 7 : index
    %c0_25 = arith.constant 0 : index
    %c0_26 = arith.constant 0 : index
    %39 = vector.load %arg3[%c7, %c0_25, %c0_26] : memref<9x16x8xf32, #tpu.memory_space<vmem>>, vector<1x16x8xf32>
    %40 = vector.shape_cast %39 : vector<1x16x8xf32> to vector<16x8xf32>
    %41 = vector.extract_strided_slice %2 {offsets = [0, 33], sizes = [8, 256], strides = [1, 1]} : vector<8x512xf32> to vector<8x256xf32>
    %cst_27 = arith.constant dense<0.000000e+00> : vector<16x256xf32>
    %42 = tpu.matmul %40, %41, %cst_27 {dimension_numbers = #tpu.dot_dimension_numbers<[1], [0], [0], [1], [0, 0, 1, 1], [], []>} : vector<16x8xf32>, vector<8x256xf32>, vector<16x256xf32> -> vector<16x256xf32>
    %43 = arith.addf %38, %42 : vector<16x256xf32>
    %c8 = arith.constant 8 : index
    %c0_28 = arith.constant 0 : index
    %c0_29 = arith.constant 0 : index
    %44 = vector.load %arg3[%c8, %c0_28, %c0_29] : memref<9x16x8xf32, #tpu.memory_space<vmem>>, vector<1x16x8xf32>
    %45 = vector.shape_cast %44 : vector<1x16x8xf32> to vector<16x8xf32>
    %46 = vector.extract_strided_slice %2 {offsets = [0, 34], sizes = [8, 256], strides = [1, 1]} : vector<8x512xf32> to vector<8x256xf32>
    %cst_30 = arith.constant dense<0.000000e+00> : vector<16x256xf32>
    %47 = tpu.matmul %45, %46, %cst_30 {dimension_numbers = #tpu.dot_dimension_numbers<[1], [0], [0], [1], [0, 0, 1, 1], [], []>} : vector<16x8xf32>, vector<8x256xf32>, vector<16x256xf32> -> vector<16x256xf32>
    %48 = arith.addf %43, %47 : vector<16x256xf32>
    %49 = vector.extract_strided_slice %48 {offsets = [0, 0], sizes = [8, 256], strides = [1, 1]} : vector<16x256xf32> to vector<8x256xf32>
    %50 = math.exp %49 : vector<8x256xf32>
    %51 = vector.extract_strided_slice %48 {offsets = [8, 0], sizes = [8, 256], strides = [1, 1]} : vector<16x256xf32> to vector<8x256xf32>
    %52 = tpu.concatenate %50, %51 in 0 : vector<8x256xf32>, vector<8x256xf32> -> vector<16x256xf32>
    %c0_31 = arith.constant 0 : index
    %c0_32 = arith.constant 0 : index
    %53 = vector.load %arg4[%c0_31, %c0_32] : memref<16x256xf32, #tpu.memory_space<vmem>>, vector<16x256xf32>
    tpu.vector_store %arg4[%c0_31, %c0_32], %52 {strides = array<i32>} : memref<16x256xf32, #tpu.memory_space<vmem>>, vector<16x256xf32>,
    return
  }
  func.func @transform_0(%arg0: i32) -> (i32, i32) {
    %c0_i32 = arith.constant 0 : i32
    %c0_i32_0 = arith.constant 0 : i32
    return %c0_i32, %arg0 : i32, i32
  }
  func.func @transform_1(%arg0: i32) -> (i32, i32) {
    %c1_i32 = arith.constant 1 : i32
    %0 = arith.addi %arg0, %c1_i32 : i32
    %c0_i32 = arith.constant 0 : i32
    %c0_i32_0 = arith.constant 0 : i32
    return %c0_i32, %0 : i32, i32
  }
  func.func @transform_2(%arg0: i32) -> (i32, i32, i32) {
    %c0_i32 = arith.constant 0 : i32
    %c0_i32_0 = arith.constant 0 : i32
    %c0_i32_1 = arith.constant 0 : i32
    %c0_i32_2 = arith.constant 0 : i32
    return %c0_i32, %c0_i32_0, %c0_i32_1 : i32, i32, i32
  }
  func.func @transform_3(%arg0: i32) -> (i32, i32) {
    %c0_i32 = arith.constant 0 : i32
    %c0_i32_0 = arith.constant 0 : i32
    return %c0_i32, %arg0 : i32, i32
  }
}

</mosaic_0001>

<bundles_post_ra>
// kernel: tpu_custom_call.1
= control target key start
LH: loop header
LB: loop body
LE: loop exit
PB: predicated region body
PF: predicated region fallthrough
CT: control target
= control target key end

     0   :  { %8 = vsyncpa [#allocation3], 0  ;;  %s1661_s0 = inlined_call_operand.vmem [shape: f32[8,768], index: 0, kind: input, shape index: {}]   ;;  %s1662_s1 = inlined_call_operand.vmem [shape: f32[8,768], index: 1, kind: input, shape index: {}]   ;;  %s1663_s2 = inlined_call_operand.vmem [shape: f32[9,16,8], index: 2, kind: input, shape index: {}]   ;;  %s1664_s3 = inlined_call_operand.hbm [shape: f32[16,512], index: 3, kind: output, shape index: {}]  }
   0x1   :  { %10 = vsyncpa [#allocation3 + $0x1], 0  ;;  %s1430_s12 = smov 0   ;;  %s1432_s13 = smov 0  }
   0x2   :  { %s1434_s14 = smov 0   ;;  %s1436_s15 = smov 0  }
   0x3 LB: > { %s1451_s16 = sadd.s32 4294967295, %s1395_s15   ;;  %s1193_s17 = sadd.s32 4294967294, %s1395_s15   ;;  %s1395_s15 = sphi %s1436_s15, %s1670_s15   ;;  %s1391_s14 = sphi %s1434_s14, %s1669_s14   ;;  %s1387_s13 = sphi %s1432_s13, %s1668_s13   ;;  %s1383_s12 = sphi %s1430_s12, %s1667_s12  }
   0x4   : > { %s1455_s18 = sadd.s32 1, %s1395_s15   ;;  %s98_s19 = sadd.s32 1, %s1391_s14 }
   0x5   : > { %s95_s20 = ssub.s32 %s1395_s15, %s1455_s18  ;;  %p108_p0 = scmp.ne.s32.totalorder %s1391_s14, %s1387_s13 }
   0x6   : > { %p96_p1 = scmp.eq.s32.totalorder %s95_s20, 0  ;;  %p109_p2 = scmp.eq.s32.totalorder %s1451_s16, 1 }
   0x7   : > { %p114_p3 = scmp.ne.s32.totalorder %s1387_s13, %s1383_s12  ;;  %p115_p4 = scmp.eq.s32.totalorder %s1193_s17, 1 }
   0x8   : > { %s1466_s21 = scalar_select %p96_p1, %s1391_s14, %s98_s19  }
   0x9   : > { %p1468_p5 = por %p109_p2, %p108_p0  ;;  %p1472_p6 = por %p115_p4, %p114_p3 }
   0xa   : > { %p1196_p7 = scmp.ge.s32.totalorder %s1395_s15, 1  ;;  %p156_p8 = scmp.lt.s32.totalorder %s1395_s15, 3 }
   0xc   : > { %p157_p9 = pnand %p1196_p7, %p156_p8 }
   0xd   : > { %s1198_s24 = sshll.u32 (!%p157_p9), %s1451_s16, 1  ;;  %s1397_s7 = smov (!%p157_p9), 111   ;;  %v1398_v3 = vmov (!%p157_p9), 0.0   ;;  %vm601_vm0 = vcmask (!%p157_p9), 908288   ;;  %vm223_vm1 = vcmask (!%p157_p9), 64512   ;;  %v1216_v9 = vld [vmem:[%s1663_s2 + $0x40] sm:$0xff] (!%p157_p9) }
   0xe   : > { %160 = sbr.rel (%p157_p9) target bundleno = 431 (0x1af), region = 32  ;;  %p187_p10 = scmp.lt.s32.totalorder (!%p157_p9), %s1198_s24, 5  ;;  %676 = vmatprep.mubr.f32.mxu0 (!%p157_p9), %v1398_v3  ;;  %294 = vmatprep.mubr.f32.mxu1 (!%p157_p9), %v1398_v3  ;;  %vm218_vm2 = vcmask (!%p157_p9), 1039360   ;;  %vm702_vm3 = vcmask (!%p157_p9), 900096   ;;  %v1202_v16 = vld [vmem:[%s1663_s2 + $0x10] sm:$0xff] (!%p157_p9)  ;;  %v1203_v22 = vld [vmem:[%s1663_s2 + $0x18] sm:$0xff] (!%p157_p9) }
   0xf   : > { %s1242_s25 = sadd.s32 (!%p157_p9), 2, %s1198_s24  ;;  %s1399_s8 = smov (!%p157_p9), 127   ;;  %v1220_v21 = vld [vmem:[%s1663_s2 + $0x50] sm:$0xff] (!%p157_p9)  ;;  %vm803_vm4 = vcmask (!%p157_p9), 785408   ;;  %v204_v26 = vld [vmem:[%s1663_s2] sm:$0xff] (!%p157_p9)  ;;  %v1221_v29 = vld [vmem:[%s1663_s2 + $0x58] sm:$0xff] (!%p157_p9) }
  0x10   : > { %p194_p11 = scmp.lt.s32.totalorder (!%p157_p9), %s1242_s25, 5  ;;  %s1400_s9 = smov (!%p157_p9), 110   ;;  %vm399_vm5 = vcmask (!%p157_p9), 1031168   ;;  %v205_v32 = vld [vmem:[%s1663_s2 + $0x8] sm:$0xff] (!%p157_p9)  ;;  %v1224_v34 = vld [vmem:[%s1663_s2 + $0x60] sm:$0xff] (!%p157_p9)  ;;  %vm904_vm6 = vcmask (!%p157_p9), 777216  }
  0x11   : > { %s1401_s10 = smov (!%p157_p9), 96   ;;  %s1402_s11 = smov (!%p157_p9), 126   ;;  %v1225_v38 = vld [vmem:[%s1663_s2 + $0x68] sm:$0xff] (!%p157_p9)  ;;  %v1208_v41 = vld [vmem:[%s1663_s2 + $0x20] sm:$0xff] (!%p157_p9)  ;;  %v1228_v44 = vld [vmem:[%s1663_s2 + $0x70] sm:$0xff] (!%p157_p9)  ;;  %vm500_vm7 = vcmask (!%p157_p9), 916480  }
  0x12   : > { %s1403_s17 = smov (!%p157_p9), 95   ;;  %s1404_s19 = smov (!%p157_p9), 112   ;;  %v1209_v47 = vld [vmem:[%s1663_s2 + $0x28] sm:$0xff] (!%p157_p9)  ;;  %v1229_v49 = vld [vmem:[%s1663_s2 + $0x78] sm:$0xff] (!%p157_p9)  ;;  %vm1005_vm8 = vcmask (!%p157_p9), 769024   ;;  %v1212_v55 = vld [vmem:[%s1663_s2 + $0x30] sm:$0xff] (!%p157_p9) }
  0x13   : > { %s1405_s20 = smov (!%p157_p9), 94   ;;  %v1232_v58 = vld [vmem:[%s1663_s2 + $0x80] sm:$0xff] (!%p157_p9)  ;;  %v1213_v59 = vld [vmem:[%s1663_s2 + $0x38] sm:$0xff] (!%p157_p9)  ;;  %v1233_v60 = vld [vmem:[%s1663_s2 + $0x88] sm:$0xff] (!%p157_p9)  ;;  %s1243_s28 = sshll.u32 (!%p157_p9), %s1451_s16, 8 }
  0x14   : > { %v1217_v61 = vld [vmem:[%s1663_s2 + $0x48] sm:$0xff] (!%p157_p9)  ;;  %s1618_s4 = scalar_lea.hbm (!%p157_p9), %s1664_s3, %s1243_s28 }
  0x15   : > { %s1672_s24 = smov (!%p187_p10, %s1198_s24), 5  ;;  %s1674_s25 = smov (!%p194_p11, %s1242_s25), 5 }
  0x16   : > { %s1199_s26 = sshll.u32 %s1672_s24, 3  ;;  %s1201_s30 = sshll.u32 %s1674_s25, 3 }
  0x17   : > { %s190_s29 = scalar_lea.vmem %s1661_s0, %s1199_s26  ;;  %s197_s6 = scalar_lea.vmem %s1662_s1, %s1201_s30 }
  0x18   : > { %v1482_v0 = vld [vmem:[%s190_s29 + $0x8] sm:$0xff]  ;;  %v1484_v1 = vld [vmem:[%s190_s29] sm:$0xff]  ;;  %s183_s24 = sand.u32 1, %s1387_s13  }
  0x19   : > { %597 = vrot.lane.b32.xlu0 %v1482_v0, %s1397_s7  ;;  %595 = vrot.lane.b32.xlu1 %v1484_v1, %s1397_s7  ;;  %v203_v2 = vld [vmem:[%s197_s6] sm:$0xff]  ;;  %s1197_s25 = sshll.u32 %s183_s24, 5  ;;  %s1620_s16 = scalar_lea.sflag [#allocation3], %s183_s24 }
  0x1a   : > { %s185_s26 = scalar_lea.vmem [#allocation2], %s1197_s25  ;;  %s1406_s6 = smov [#allocation2]  }
  0x1b   : > { %s1119_s27 = sshll.u32 %s185_s26, 4  ;;  %s1613_s27 = int_to_ptr.vmem [resolvable:$true] %s1119_s27 }
  0x1c   : > { %s1333_s5 = scalar_lea.vmem %s1613_s27, 512 }
  0x1d   : > { %599 = vrot.lane.b32.xlu0 %v203_v2, %s1397_s7  ;;  %214 = vrot.lane.b32.xlu1 %v1482_v0, %s1399_s8  ;;  %p1334_p12 = scmp.ne.s32.totalorder %s1613_s27, %s1333_s5  ;;  %s1337_s7 = sshll.u32 %s1406_s6, 4  ;;  %s1338_s7 = int_to_ptr.vmem [resolvable:$false] %s1337_s7 }
  0x1e   : > { %p1340_p1 = scmp.lt.s32.totalorder %s1613_s27, %s1338_s7 }
  0x1f   : > { %p1335_p13 = pnand %p1334_p12, %p1468_p5 }
  0x21   : > { %216 = vrot.lane.b32.xlu0 %v203_v2, %s1399_s8  ;;  %698 = vrot.lane.b32.xlu1 %v1482_v0, %s1400_s9  ;;  %p1336_p0 = pneg %p1335_p13 }
  0x25   : > { %700 = vrot.lane.b32.xlu0 %v203_v2, %s1400_s9  ;;  %212 = vrot.lane.b32.xlu1 %v1484_v1, %s1399_s8  ;;  %s1339_s8 = scalar_lea.vmem %s1338_s7, 1024 }
  0x26   : > { %p1341_p2 = scmp.lt.s32.totalorder %s1339_s8, %s1333_s5 }
  0x28   : > { %p1342_p3 = por %p1341_p2, %p1340_p1 }
  0x29   : > { %696 = vrot.lane.b32.xlu0 %v1484_v1, %s1400_s9  ;;  %799 = vrot.lane.b32.xlu1 %v1482_v0, %s1401_s10 }
  0x2a   : > { %p1343_p4 = pnand %p1342_p3, %p1336_p0 }
  0x2d   : > { %801 = vrot.lane.b32.xlu0 %v203_v2, %s1401_s10  ;;  %797 = vrot.lane.b32.xlu1 %v1484_v1, %s1401_s10 }
  0x31   : > { %395 = vrot.lane.b32.xlu0 %v1482_v0, %s1402_s11  ;;  %397 = vrot.lane.b32.xlu1 %v203_v2, %s1402_s11 }
  0x35   : > { %900 = vrot.lane.b32.xlu0 %v1482_v0, %s1403_s17  ;;  %902 = vrot.lane.b32.xlu1 %v203_v2, %s1403_s17 }
  0x39   : > { %393 = vrot.lane.b32.xlu0 %v1484_v1, %s1402_s11  ;;  %898 = vrot.lane.b32.xlu1 %v1484_v1, %s1403_s17 }
  0x3d   : > { %496 = vrot.lane.b32.xlu0 %v1482_v0, %s1404_s19  ;;  %498 = vrot.lane.b32.xlu1 %v203_v2, %s1404_s19 }
  0x41   : > { %1001 = vrot.lane.b32.xlu0 %v1482_v0, %s1405_s20  ;;  %1003 = vrot.lane.b32.xlu1 %v203_v2, %s1405_s20 }
  0x45   : > { %494 = vrot.lane.b32.xlu0 %v1484_v1, %s1404_s19  ;;  %999 = vrot.lane.b32.xlu1 %v1484_v1, %s1405_s20 }
  0x8b   : > { %v598_v4 = vpop.permute.xlu0 %597  ;;  %v596_v5 = vpop.permute.xlu1 %595 }
  0x8c   : > { %v1513_v10 = vsel %vm601_vm0, %v596_v5, %v598_v4 }
  0x8f   : > { %v600_v6 = vpop.permute.xlu0 %599  ;;  %v215_v7 = vpop.permute.xlu1 %214 }
  0x90   : > { %v1507_v8 = vsel %vm601_vm0, %v598_v4, %v600_v6 }
  0x91   : > { %612 = vmatprep.subr.mxu0 %v1507_v8 }
  0x92   : > { %613 = vmatpush1.msra.mxu0 %v1513_v10 }
  0x93   : > { %v217_v11 = vpop.permute.xlu0 %216  ;;  %v699_v12 = vpop.permute.xlu1 %698  ;;  %1218 = vmatmul.mubr.msk.f32.vlgmr.msra.gmra.mrb[0].mxu0 %vm223_vm1, %v1216_v9 }
  0x94   : > { %v220_v13 = vsel %vm218_vm2, %v215_v7, %v217_v11  ;;  %777 = vmatprep.mubr.f32.mxu0 %v1398_v3 }
  0x95   : > { %230 = vmatprep.subr.mxu1 %v220_v13 }
  0x97   : > { %v701_v14 = vpop.permute.xlu0 %700  ;;  %v213_v15 = vpop.permute.xlu1 %212 }
  0x98   : > { %v219_v17 = vsel %vm218_vm2, %v213_v15, %v215_v7  ;;  %v704_v18 = vsel %vm702_vm3, %v699_v12, %v701_v14 }
  0x99   : > { %231 = vmatpush1.msra.mxu1 %v219_v17  ;;  %713 = vmatprep.subr.mxu0 %v704_v18 }
  0x9a   : > { %1204 = vmatmul.mubr.msk.f32.vlgmr.msra.gmra.mrb[0].mxu1 %vm223_vm1, %v1202_v16  ;;  %313 = vmatprep.subr.mxu1 %v1482_v0 }
  0x9b   : > { %v697_v19 = vpop.permute.xlu0 %696  ;;  %v800_v20 = vpop.permute.xlu1 %799  ;;  %314 = vmatpush1.msra.mxu1 %v1484_v1  ;;  %300 = vmatprep.mubr.f32.mxu1 %v1398_v3 }
  0x9c   : > { %v703_v23 = vsel %vm702_vm3, %v697_v19, %v699_v12 }
  0x9d   : > { %714 = vmatpush1.msra.mxu0 %v703_v23 }
  0x9e   : > { %1222 = vmatmul.mubr.msk.f32.vlgmr.msra.gmra.mrb[0].mxu0 %vm223_vm1, %v1220_v21  ;;  %1205 = vmatmul.mubr.msk.f32.gmra.mrb[2].mxu1 %vm223_vm1, %v1203_v22 }
  0x9f   : > { %v802_v24 = vpop.permute.xlu0 %801  ;;  %v798_v25 = vpop.permute.xlu1 %797  ;;  %783 = vmatprep.mubr.f32.mxu0 %v1398_v3  ;;  %377 = vmatprep.mubr.f32.mxu1 %v1398_v3 }
  0xa0   : > { %v804_v27 = vsel %vm803_vm4, %v798_v25, %v800_v20  ;;  %v805_v28 = vsel %vm803_vm4, %v800_v20, %v802_v24 }
  0xa1   : > { %814 = vmatprep.subr.mxu0 %v805_v28 }
  0xa2   : > { %815 = vmatpush1.msra.mxu0 %v804_v27  ;;  %1206 = vmatmul.mubr.msk.f32.vlgmr.msra.gmra.mrb[0].mxu1 %vm223_vm1, %v204_v26 }
  0xa3   : > { %v396_v30 = vpop.permute.xlu0 %395  ;;  %v398_v31 = vpop.permute.xlu1 %397  ;;  %1223 = vmatmul.mubr.msk.f32.gmra.mrb[2].mxu0 %vm223_vm1, %v1221_v29  ;;  %383 = vmatprep.mubr.f32.mxu1 %v1398_v3 }
  0xa4   : > { %v401_v33 = vsel %vm399_vm5, %v396_v30, %v398_v31  ;;  %878 = vmatprep.mubr.f32.mxu0 %v1398_v3 }
  0xa5   : > { %410 = vmatprep.subr.mxu1 %v401_v33 }
  0xa6   : > { %1207 = vmatmul.mubr.msk.f32.gmra.mrb[2].mxu1 %vm223_vm1, %v205_v32 }
  0xa7   : > { %v901_v35 = vpop.permute.xlu0 %900  ;;  %v903_v36 = vpop.permute.xlu1 %902  ;;  %1226 = vmatmul.mubr.msk.f32.vlgmr.msra.gmra.mrb[0].mxu0 %vm223_vm1, %v1224_v34  ;;  %474 = vmatprep.mubr.f32.mxu1 %v1398_v3 }
  0xa8   : > { %v906_v37 = vsel %vm904_vm6, %v901_v35, %v903_v36  ;;  %884 = vmatprep.mubr.f32.mxu0 %v1398_v3 }
  0xa9   : > { %915 = vmatprep.subr.mxu0 %v906_v37 }
  0xab   : > { %v394_v39 = vpop.permute.xlu0 %393  ;;  %v899_v40 = vpop.permute.xlu1 %898  ;;  %1227 = vmatmul.mubr.msk.f32.gmra.mrb[2].mxu0 %vm223_vm1, %v1225_v38 }
  0xac   : > { %v400_v42 = vsel %vm399_vm5, %v394_v39, %v396_v30  ;;  %v905_v43 = vsel %vm904_vm6, %v899_v40, %v901_v35  ;;  %979 = vmatprep.mubr.f32.mxu0 %v1398_v3 }
  0xad   : > { %411 = vmatpush1.msra.mxu1 %v400_v42  ;;  %916 = vmatpush1.msra.mxu0 %v905_v43 }
  0xae   : > { %1210 = vmatmul.mubr.msk.f32.vlgmr.msra.gmra.mrb[0].mxu1 %vm223_vm1, %v1208_v41 }
  0xaf   : > { %v497_v45 = vpop.permute.xlu0 %496  ;;  %v499_v46 = vpop.permute.xlu1 %498  ;;  %1230 = vmatmul.mubr.msk.f32.vlgmr.msra.gmra.mrb[0].mxu0 %vm223_vm1, %v1228_v44  ;;  %480 = vmatprep.mubr.f32.mxu1 %v1398_v3 }
  0xb0   : > { %v502_v48 = vsel %vm500_vm7, %v497_v45, %v499_v46  ;;  %985 = vmatprep.mubr.f32.mxu0 %v1398_v3 }
  0xb1   : > { %511 = vmatprep.subr.mxu1 %v502_v48 }
  0xb2   : > { %1211 = vmatmul.mubr.msk.f32.gmra.mrb[2].mxu1 %vm223_vm1, %v1209_v47 }
  0xb3   : > { %v1002_v50 = vpop.permute.xlu0 %1001  ;;  %v1004_v51 = vpop.permute.xlu1 %1003  ;;  %1231 = vmatmul.mubr.msk.f32.gmra.mrb[2].mxu0 %vm223_vm1, %v1229_v49  ;;  %575 = vmatprep.mubr.f32.mxu1 %v1398_v3 }
  0xb4   : > { %v1007_v52 = vsel %vm1005_vm8, %v1002_v50, %v1004_v51  ;;  %1080 = vmatprep.mubr.f32.mxu0 %v1398_v3 }
  0xb5   : > { %1016 = vmatprep.subr.mxu0 %v1007_v52 }
  0xb7   : > { %v495_v53 = vpop.permute.xlu0 %494  ;;  %v1000_v54 = vpop.permute.xlu1 %999 }
  0xb8   : > { %v501_v56 = vsel %vm500_vm7, %v495_v53, %v497_v45  ;;  %v1006_v57 = vsel %vm1005_vm8, %v1000_v54, %v1002_v50 }
  0xb9   : > { %512 = vmatpush1.msra.mxu1 %v501_v56  ;;  %1017 = vmatpush1.msra.mxu0 %v1006_v57 }
  0xba   : > { %1214 = vmatmul.mubr.msk.f32.vlgmr.msra.gmra.mrb[0].mxu1 %vm223_vm1, %v1212_v55  ;;  %1244 = vmatprep.subr.mxu1 %v1507_v8 }
  0xbb   : > { %1234 = vmatmul.mubr.msk.f32.vlgmr.msra.gmra.mrb[0].mxu0 %vm223_vm1, %v1232_v58  ;;  %1245 = vmatpush1.msra.mxu1 %v1513_v10 }
  0xbc   : > { %581 = vmatprep.mubr.f32.mxu1 %v1398_v3  ;;  %1086 = vmatprep.mubr.f32.mxu0 %v1398_v3 }
  0xbe   : > { %1215 = vmatmul.mubr.msk.f32.gmra.mrb[2].mxu1 %vm223_vm1, %v1213_v59 }
  0xbf   : > { %1235 = vmatmul.mubr.msk.f32.gmra.mrb[2].mxu0 %vm223_vm1, %v1233_v60  ;;  %682 = vmatprep.mubr.f32.mxu1 %v1398_v3 }
  0xc6   : > { %1219 = vmatmul.mubr.msk.f32.vlgmr.msra.gmra.mrb[2].mxu1 %vm223_vm1, %v1217_v61 }
 0x18d   : > { %v577_v62 = vpop.f32.mrb[0].mxu1 }
 0x18e   : > { %v1082_v63 = vpop.f32.mrb[0].mxu0  ;;  %v579_v0 = vpop.f32.mrb[1].mxu1 }
 0x18f   : > { %v1246_v1 = vadd.f32 %v1082_v63, %v577_v62  ;;  %v1084_v2 = vpop.f32.mrb[1].mxu0 }
 0x190   : > { %v1247_v4 = vadd.f32 %v1084_v2, %v579_v0 }
 0x191   : > { %v1097_v5 = vmul.f32 1.442695, %v1246_v1 }
 0x192   : > { %v1099_v6 = vmul.f32 1.442695, %v1247_v4  ;;  %v1088_v7 = vpop.f32.mrb[2].mxu0 }
 0x193   : > { %1329 = vpow2.f32 %v1097_v5  ;;  %v1090_v3 = vpop.f32.mrb[3].mxu0 }
 0x194   : > { %1331 = vpow2.f32 %v1099_v6 }
 0x199   : > { %v684_v8 = vpop.f32.mrb[2].mxu1 }
 0x19a   : > { %v1248_v9 = vadd.f32 %v1088_v7, %v684_v8  ;;  %v686_v10 = vpop.f32.mrb[3].mxu1 }
 0x19b   : > { %v1249_v11 = vadd.f32 %v1090_v3, %v686_v10 }
 0x19c   : > { %1103 = vst [vmem:[%s185_s26 + $0x10] sm:$0xff] %v1248_v9 }
 0x19d   : > { %v1330_v12 = vpop.eup %1329  ;;  %1104 = vst [vmem:[%s185_s26 + $0x18] sm:$0xff] %v1249_v11 }
 0x19e   : > { %v1332_v13 = vpop.eup %1331  ;;  %1101 = vst [vmem:[%s185_s26] sm:$0xff] %v1330_v12 }
 0x19f   : > { %1102 = vst [vmem:[%s185_s26 + $0x8] sm:$0xff] %v1332_v13 }
 0x1a0   : > { %1346 = shalt.err (!%p1343_p4)
}
 0x1a1   : > { %s1347_s9 = scalar_lea.hbm %s1618_s4, 512  ;;  %s1351_s17 = scalar_lea.hbm %s1664_s3, 1024 }
 0x1a2   : > { %p1348_p7 = scmp.ne.s32.totalorder %s1618_s4, %s1347_s9  ;;  %p1352_p10 = scmp.lt.u32.totalorder %s1618_s4, %s1664_s3 }
 0x1a3   : > { %p1353_p11 = scmp.lt.u32.totalorder %s1351_s17, %s1347_s9  ;;  %p1355_p13 = scmp.lt.u32.totalorder %s1347_s9, %s1618_s4 }
 0x1a4   : > { %p1349_p8 = pnand %p1348_p7, %p1468_p5 }
 0x1a5   : > { %p1354_p12 = por %p1353_p11, %p1352_p10 }
 0x1a6   : > { %p1350_p9 = pneg %p1349_p8 }
 0x1a7   : > { %p1356_p0 = por %p1355_p13, %p1354_p12 }
 0x1a9   : > { %p1357_p1 = pnand %p1356_p0, %p1350_p9 }
 0x1ab   : > { %1360 = shalt.err (!%p1357_p1)
}
 0x1ac   : > { %s1407_s24 = smov 256   ;;  %s1408_s25 = smov 512  }
 0x1ad   : > { %s1409_s26 = smov 16  }
 0x1ae   : > { %1278 = dma.vmem_to_hbm [thread:$0]  (%p1468_p5), %s1613_s27, 512, %s1618_s4, %s1620_s16, %s1407_s24, %s1408_s25, %s1409_s26  }
 0x1af PF: > { %p1284_p2 = scmp.ge.s32.totalorder %s1395_s15, 2  ;;  %s1134_s28 = sand.u32 1, %s1383_s12  }
 0x1b0   : > { %s1135_s29 = scalar_lea.sflag [#allocation3], %s1134_s28 }
 0x1b1   : > { %p1281_p3 = pnand %p1284_p2, %p1472_p6 }
 0x1b3   : > { %1378 = dma.done.wait (!%p1281_p3), %s1135_s29, 512  }
 0x1b4   : > { %1380 = vsyncadd (!%p1281_p3), %s1135_s29, 4294966784  ;;  %p13_p4 = scmp.ge.s32.totalorder %s1455_s18, 4   ;;  %s1667_s12 = smov %s1387_s13 }
 0x1b5   : > { %s1668_s13 = smov %s1391_s14  ;;  %s1669_s14 = smov %s1466_s21 }
 0x1b6   : > { %s1670_s15 = smov %s1455_s18  ;;  %15 = sbr.rel (!%p13_p4) target bundleno = 3 (0x3), region = 78 }
 0x1bd   :  { %1140 = vsyncpa [#allocation3], 1 }
 0x1be   :  { %1142 = vsyncpa [#allocation3 + $0x1], 1 }

</bundles_post_ra>
